<compile_context>
chip_gen: v6e
topology: v6e:2x2x1
jax: 0.10.0
libtpu: 0.0.40
codegen_flags: <defaults>
</compile_context>

<pallas_src>
import math

import numpy as np
import jax
import jax.numpy as jnp
from jax.experimental import pallas as pl
from jax.experimental.pallas import tpu as pltpu

# ----------------------------- model hyperparams -----------------------------
FEATURE_SIZE = 16   # F
HIDDEN_DIM   = 32   # H
NUM_LAYERS   = 2    # L
KERNEL_SIZE  = 3    # K (odd)
MAX_LEN      = 16
BATCH        = 2    # B
SEQ_LEN      = 8    # S
SCALE        = math.sqrt(0.5)
PAD          = (KERNEL_SIZE - 1) // 2

SLAB_WIDTH = 128    # lane-dense parameter slab width

assert KERNEL_SIZE % 2 == 1, "Kernel size must be odd!"
assert (BATCH * SEQ_LEN) % 8 == 0, "B*S must be a multiple of 8 sublanes"


def _round8(n):
    return (n + 7) // 8 * 8


# ------------------------- parameter slab layout ------------------------------
def build_param_layout(B, S, F, H, L, K):
    """Row-block layout for the single packed parameter slab.

    Every block starts at an 8-row-aligned offset and column 0, so the static
    in-kernel views load at aligned sublane offsets with no relayout.
    """
    layout = {}
    row = 0

    def add(name, shape):
        nonlocal row
        layout[name] = (row, shape)
        row += _round8(shape[0])

    add("pe", (B * S, F))          # PE already tiled over batch
    add("we", (F, H))              # emb2hid weight^T
    add("be", (1, H))
    add("wh", (H, F))              # hid2emb weight^T
    add("bh", (1, F))
    for l in range(L):
        for k in range(K):
            add(f"wa_{l}_{k}", (H, H))   # conv tap k, GLU value half
            add(f"wb_{l}_{k}", (H, H))   # conv tap k, GLU gate half
        add(f"ba_{l}", (1, H))
        add(f"bb_{l}", (1, H))
    return layout, row


# --------------------------------- factory ------------------------------------
def make_encoder(B, S, F, H, L, K):
    layout, total_rows = build_param_layout(B, S, F, H, L, K)
    BS = B * S

    # ------------------------------- kernel -----------------------------------
    def encoder_kernel(x_ref, p_ref, out_ref):
        def view(name):
            r, (nr, nc) = layout[name]
            return p_ref[r:r + nr, :nc]        # static slice, aligned offsets

        x = x_ref[...].astype(jnp.float32)     # (BS, F)

        # combined = dropout(pos_encoding(x) + x) = 2*x + pe   (dropout = identity)
        combined = x + x + view("pe")

        # emb2hid
        h = jnp.dot(combined, view("we"),
                    preferred_element_type=jnp.float32) + view("be")   # (BS, H)

        # Boundary masks hoisted out of the layer loop (JAX does not CSE
        # broadcast_in_dim).  Per-sequence row index (row % S) keeps conv taps
        # from leaking across the batch seam.
        t_local = jax.lax.broadcasted_iota(jnp.int32, (BS, 1), 0) % S
        mask_f = {}
        for k in range(K):
            d = k - PAD
            if d != 0:
                m = ((t_local + d >= 0) & (t_local + d < S)).astype(jnp.float32)
                mask_f[k] = jnp.broadcast_to(m, (BS, H))

        # conv blocks: per layer, K accumulating (BS,H)@(H,H) matmuls per GLU
        # half (no tap concat, no lane-offset GLU slice).
        for l in range(L):
            taps = []
            for k in range(K):
                d = k - PAD
                if d == 0:
                    taps.append(h)                             # center tap: no shift
                else:
                    src = pltpu.roll(h, (-d) % BS, axis=0)     # src[r] = h[(r+d) % BS]
                    taps.append(src * mask_f[k])               # zero-pad boundaries
            acc_a = view(f"ba_{l}")                            # (1, H) -> broadcasts
            acc_g = view(f"bb_{l}")
            for k in range(K):
                acc_a = acc_a + jnp.dot(taps[k], view(f"wa_{l}_{k}"),
                                        preferred_element_type=jnp.float32)
                acc_g = acc_g + jnp.dot(taps[k], view(f"wb_{l}_{k}"),
                                        preferred_element_type=jnp.float32)
            y = acc_a * jax.nn.sigmoid(acc_g)                  # GLU (EUP + VPU)
            h = (y + h) * SCALE                                # residual + scale

        # hid2emb + final residual
        x_out = jnp.dot(h, view("wh"),
                        preferred_element_type=jnp.float32) + view("bh")
        combined_out = (x_out + combined) * SCALE

        # single packed output slab: [x_out | combined_out]
        out_ref[...] = jnp.concatenate([x_out, combined_out], axis=1).astype(out_ref.dtype)

    # ------------------------------ grid spec ----------------------------------
    # NOTE: at BS = 16 the whole problem lives in one grid step / one TensorCore.
    # For larger batches, tile rows over a grid axis marked "parallel" so v7x's
    # second TensorCore gets used and VMEM stays bounded.
    grid_spec = pltpu.PrefetchScalarGridSpec(
        num_scalar_prefetch=0,
        grid=(1,),
        in_specs=[
            pl.BlockSpec((BS, F), lambda i: (0, 0)),                   # x (batch folded into rows)
            pl.BlockSpec((total_rows, SLAB_WIDTH), lambda i: (0, 0)),  # packed parameter slab
        ],
        out_specs=pl.BlockSpec((BS, 2 * F), lambda i: (0, 0)),
    )

    @jax.jit
    def encoder_forward(x, param_slab):
        x2 = x.reshape(BS, F)          # contiguity-preserving (bitcast under jit)
        out = pl.pallas_call(
            encoder_kernel,
            out_shape=jax.ShapeDtypeStruct((BS, 2 * F), x.dtype),
            grid_spec=grid_spec,
            compiler_params=pltpu.CompilerParams(
                dimension_semantics=("arbitrary",)),
        )(x2, param_slab)
        x_out = out[:, :F].reshape(B, S, F)
        combined_out = out[:, F:].reshape(B, S, F)
        return x_out, combined_out

    # --------------------------- one-time param prep ---------------------------
    def prepare_params(pe, we, be, wh, bh, wa, wb, ba, bb):
        """Pack all parameters (and the batch-tiled PE table) into one slab.

        Called once at init -- keeps concat/tile/reshape traffic out of the
        per-call dispatch path.
        """
        slab = np.zeros((total_rows, SLAB_WIDTH), np.float32)

        def put(name, arr):
            r, shape = layout[name]
            slab[r:r + shape[0], :shape[1]] = np.asarray(arr, np.float32).reshape(shape)

        put("pe", np.tile(np.asarray(pe, np.float32), (B, 1)))
        put("we", we); put("be", be)
        put("wh", wh); put("bh", bh)
        wa_np, wb_np = np.asarray(wa, np.float32), np.asarray(wb, np.float32)
        ba_np, bb_np = np.asarray(ba, np.float32), np.asarray(bb, np.float32)
        for l in range(L):
            for k in range(K):
                put(f"wa_{l}_{k}", wa_np[l, k])
                put(f"wb_{l}_{k}", wb_np[l, k])
            put(f"ba_{l}", ba_np[l])
            put(f"bb_{l}", bb_np[l])
        return jnp.asarray(slab)

    return prepare_params, encoder_forward


# --------------------------- pure-JAX reference -------------------------------
def encoder_reference(x, pe, we, be, wh, bh, wa, wb, ba, bb):
    B, S, F = x.shape
    combined = x + pe[None] + x
    h = combined @ we + be                                       # (B, S, H)
    for l in range(NUM_LAYERS):
        a = jnp.broadcast_to(ba[l], h.shape)
        b = jnp.broadcast_to(bb[l], h.shape)
        hp = jnp.pad(h, ((0, 0), (PAD, PAD), (0, 0)))
        for k in range(KERNEL_SIZE):
            shifted = hp[:, k:k + S, :]
            a = a + shifted @ wa[l, k]
            b = b + shifted @ wb[l, k]
        y = a * jax.nn.sigmoid(b)
        h = (y + h) * SCALE
    x_out = h @ wh + bh
    combined_out = (x_out + combined) * SCALE
    return x_out, combined_out


def sinusoidal_pe(max_len, d_model):
    pos = jnp.arange(max_len, dtype=jnp.float32)[:, None]
    div = jnp.exp(jnp.arange(0, d_model, 2, dtype=jnp.float32)
                  * (-math.log(10000.0) / d_model))
    pe = jnp.zeros((max_len, d_model), dtype=jnp.float32)
    pe = pe.at[:, 0::2].set(jnp.sin(pos * div))
    pe = pe.at[:, 1::2].set(jnp.cos(pos * div))
    return pe


# ----------------------------------- main -------------------------------------
if __name__ == "__main__":
    key = jax.random.PRNGKey(0)
    ks = jax.random.split(key, 9)

    B, S, F, H, L, K = BATCH, SEQ_LEN, FEATURE_SIZE, HIDDEN_DIM, NUM_LAYERS, KERNEL_SIZE

    x = jax.random.normal(ks[0], (B, S, F), dtype=jnp.float32)
    pe = sinusoidal_pe(MAX_LEN, F)[:S]                            # (S, F)

    # Deterministic synthetic parameters (stored pre-transposed for (S, C) @ (C, O)).
    we = jax.random.normal(ks[1], (F, H), dtype=jnp.float32) * 0.1   # emb2hid weight^T
    be = jax.random.normal(ks[2], (1, H), dtype=jnp.float32) * 0.1
    wh = jax.random.normal(ks[3], (H, F), dtype=jnp.float32) * 0.1   # hid2emb weight^T
    bh = jax.random.normal(ks[4], (1, F), dtype=jnp.float32) * 0.1
    # Conv1d weight (2H, H, K) split into GLU halves, laid out as (L, K, H_in, H_out).
    wa = jax.random.normal(ks[5], (L, K, H, H), dtype=jnp.float32) * 0.1
    wb = jax.random.normal(ks[6], (L, K, H, H), dtype=jnp.float32) * 0.1
    ba = jax.random.normal(ks[7], (L, 1, H), dtype=jnp.float32) * 0.1
    bb = jax.random.normal(ks[8], (L, 1, H), dtype=jnp.float32) * 0.1

    prepare_params, encoder_forward = make_encoder(B, S, F, H, L, K)

    # One-time packing (outside the per-call path).
    param_slab = prepare_params(pe, we, be, wh, bh, wa, wb, ba, bb)
    jax.block_until_ready(param_slab)

    x_out, combined_out = encoder_forward(x, param_slab)
    jax.block_until_ready((x_out, combined_out))

    x_ref, c_ref = encoder_reference(x, pe, we, be, wh, bh, wa, wb, ba, bb)
    if not (jnp.allclose(x_out, x_ref, atol=1e-4, rtol=1e-4)
            and jnp.allclose(combined_out, c_ref, atol=1e-4, rtol=1e-4)):
        raise AssertionError("Pallas kernel does not match JAX reference")

    print("KERNEL_OK")
</pallas_src>

<mosaic_0001>
module attributes {stable_mosaic.version = 11 : i64} {
  func.func @encoder_kernel(%arg0: i32, %arg1: memref<16x16xf32, #tpu.memory_space<vmem>>, %arg2: memref<496x128xf32, #tpu.memory_space<vmem>>, %arg3: memref<16x32xf32, #tpu.memory_space<vmem>>) attributes {dimension_semantics = [#tpu.dimension_semantics<arbitrary>], iteration_bounds = array<i64: 1>, scalar_prefetch = 0 : i64, scratch_operands = 0 : i64, tpu.core_type = #tpu.core_type<tc>, window_params = [{pipeline_mode = #tpu.pipeline_mode<synchronous>, transform_indices = @transform_0, window_bounds = array<i64: 16, 16>}, {pipeline_mode = #tpu.pipeline_mode<synchronous>, transform_indices = @transform_1, window_bounds = array<i64: 496, 128>}, {pipeline_mode = #tpu.pipeline_mode<synchronous>, transform_indices = @transform_2, window_bounds = array<i64: 16, 32>}]} {
    %c0 = arith.constant 0 : index
    %c0_0 = arith.constant 0 : index
    %0 = vector.load %arg1[%c0, %c0_0] : memref<16x16xf32, #tpu.memory_space<vmem>>, vector<16x16xf32>
    %1 = arith.addf %0, %0 : vector<16x16xf32>
    %c0_1 = arith.constant 0 : index
    %c0_2 = arith.constant 0 : index
    %2 = vector.load %arg2[%c0_1, %c0_2] : memref<496x128xf32, #tpu.memory_space<vmem>>, vector<16x16xf32>
    %3 = arith.addf %1, %2 : vector<16x16xf32>
    %c16 = arith.constant 16 : index
    %c0_3 = arith.constant 0 : index
    %4 = vector.load %arg2[%c16, %c0_3] : memref<496x128xf32, #tpu.memory_space<vmem>>, vector<16x32xf32>
    %cst = arith.constant dense<0.000000e+00> : vector<16x32xf32>
    %5 = tpu.matmul %3, %4, %cst {dimension_numbers = #tpu.dot_dimension_numbers<[1], [0], [0], [1], [0, 0, 1, 1], [], []>} : vector<16x16xf32>, vector<16x32xf32>, vector<16x32xf32> -> vector<16x32xf32>
    %c32 = arith.constant 32 : index
    %c0_4 = arith.constant 0 : index
    %6 = vector.load %arg2[%c32, %c0_4] : memref<496x128xf32, #tpu.memory_space<vmem>>, vector<1x32xf32>
    %7 = vector.broadcast %6 : vector<1x32xf32> to vector<16x32xf32>
    %8 = arith.addf %5, %7 : vector<16x32xf32>
    %9 = tpu.iota {dimensions = array<i32: 0>} : vector<16x1xi32>
    %c8_i32 = arith.constant 8 : i32
    %c0_i32 = arith.constant 0 : i32
    %10 = arith.cmpi eq, %c8_i32, %c0_i32 : i32
    %c1_i32 = arith.constant 1 : i32
    %11 = arith.select %10, %c1_i32, %c8_i32 : i32
    %12 = vector.broadcast %11 : i32 to vector<16x1xi32>
    %13 = arith.remsi %9, %12 : vector<16x1xi32>
    %c0_i32_5 = arith.constant 0 : i32
    %14 = vector.broadcast %c0_i32_5 : i32 to vector<16x1xi32>
    %15 = arith.cmpi ne, %13, %14 : vector<16x1xi32>
    %c0_i32_6 = arith.constant 0 : i32
    %16 = vector.broadcast %c0_i32_6 : i32 to vector<16x1xi32>
    %17 = arith.cmpi slt, %13, %16 : vector<16x1xi32>
    %c0_i32_7 = arith.constant 0 : i32
    %18 = arith.cmpi slt, %11, %c0_i32_7 : i32
    %19 = vector.broadcast %18 : i1 to vector<16x1xi1>
    %20 = vector.broadcast %19 : vector<16x1xi1> to vector<16x1xi1>
    %21 = arith.xori %17, %20 : vector<16x1xi1>
    %22 = arith.andi %21, %15 : vector<16x1xi1>
    %23 = vector.broadcast %11 : i32 to vector<16x1xi32>
    %24 = arith.addi %13, %23 : vector<16x1xi32>
    %25 = arith.select %22, %24, %13 : vector<16x1xi1>, vector<16x1xi32>
    %c-1_i32 = arith.constant -1 : i32
    %26 = vector.broadcast %c-1_i32 : i32 to vector<16x1xi32>
    %27 = arith.addi %25, %26 : vector<16x1xi32>
    %c0_i32_8 = arith.constant 0 : i32
    %28 = vector.broadcast %c0_i32_8 : i32 to vector<16x1xi32>
    %29 = arith.cmpi sge, %27, %28 : vector<16x1xi32>
    %c-1_i32_9 = arith.constant -1 : i32
    %30 = vector.broadcast %c-1_i32_9 : i32 to vector<16x1xi32>
    %31 = arith.addi %25, %30 : vector<16x1xi32>
    %c8_i32_10 = arith.constant 8 : i32
    %32 = vector.broadcast %c8_i32_10 : i32 to vector<16x1xi32>
    %33 = arith.cmpi slt, %31, %32 : vector<16x1xi32>
    %34 = arith.andi %29, %33 : vector<16x1xi1>
    %35 = arith.extui %34 : vector<16x1xi1> to vector<16x1xi32>
    %36 = arith.sitofp %35 : vector<16x1xi32> to vector<16x1xf32>
    %37 = vector.shape_cast %36 : vector<16x1xf32> to vector<16x1xf32>
    %38 = vector.broadcast %37 : vector<16x1xf32> to vector<16x32xf32>
    %c1_i32_11 = arith.constant 1 : i32
    %39 = vector.broadcast %c1_i32_11 : i32 to vector<16x1xi32>
    %40 = arith.addi %25, %39 : vector<16x1xi32>
    %c0_i32_12 = arith.constant 0 : i32
    %41 = vector.broadcast %c0_i32_12 : i32 to vector<16x1xi32>
    %42 = arith.cmpi sge, %40, %41 : vector<16x1xi32>
    %c1_i32_13 = arith.constant 1 : i32
    %43 = vector.broadcast %c1_i32_13 : i32 to vector<16x1xi32>
    %44 = arith.addi %25, %43 : vector<16x1xi32>
    %c8_i32_14 = arith.constant 8 : i32
    %45 = vector.broadcast %c8_i32_14 : i32 to vector<16x1xi32>
    %46 = arith.cmpi slt, %44, %45 : vector<16x1xi32>
    %47 = arith.andi %42, %46 : vector<16x1xi1>
    %48 = arith.extui %47 : vector<16x1xi1> to vector<16x1xi32>
    %49 = arith.sitofp %48 : vector<16x1xi32> to vector<16x1xf32>
    %50 = vector.shape_cast %49 : vector<16x1xf32> to vector<16x1xf32>
    %51 = vector.broadcast %50 : vector<16x1xf32> to vector<16x32xf32>
    %c1_i32_15 = arith.constant 1 : i32
    %52 = tpu.dynamic_rotate %8 by %c1_i32_15 dim 0 : vector<16x32xf32>, i32 -> vector<16x32xf32>
    %53 = arith.mulf %52, %38 : vector<16x32xf32>
    %c15_i32 = arith.constant 15 : i32
    %54 = tpu.dynamic_rotate %8 by %c15_i32 dim 0 : vector<16x32xf32>, i32 -> vector<16x32xf32>
    %55 = arith.mulf %54, %51 : vector<16x32xf32>
    %c272 = arith.constant 272 : index
    %c0_16 = arith.constant 0 : index
    %56 = vector.load %arg2[%c272, %c0_16] : memref<496x128xf32, #tpu.memory_space<vmem>>, vector<1x32xf32>
    %c280 = arith.constant 280 : index
    %c0_17 = arith.constant 0 : index
    %57 = vector.load %arg2[%c280, %c0_17] : memref<496x128xf32, #tpu.memory_space<vmem>>, vector<1x32xf32>
    %c80 = arith.constant 80 : index
    %c0_18 = arith.constant 0 : index
    %58 = vector.load %arg2[%c80, %c0_18] : memref<496x128xf32, #tpu.memory_space<vmem>>, vector<32x32xf32>
    %cst_19 = arith.constant dense<0.000000e+00> : vector<16x32xf32>
    %59 = tpu.matmul %53, %58, %cst_19 {dimension_numbers = #tpu.dot_dimension_numbers<[1], [0], [0], [1], [0, 0, 1, 1], [], []>} : vector<16x32xf32>, vector<32x32xf32>, vector<16x32xf32> -> vector<16x32xf32>
    %60 = vector.broadcast %56 : vector<1x32xf32> to vector<16x32xf32>
    %61 = arith.addf %60, %59 : vector<16x32xf32>
    %c112 = arith.constant 112 : index
    %c0_20 = arith.constant 0 : index
    %62 = vector.load %arg2[%c112, %c0_20] : memref<496x128xf32, #tpu.memory_space<vmem>>, vector<32x32xf32>
    %cst_21 = arith.constant dense<0.000000e+00> : vector<16x32xf32>
    %63 = tpu.matmul %53, %62, %cst_21 {dimension_numbers = #tpu.dot_dimension_numbers<[1], [0], [0], [1], [0, 0, 1, 1], [], []>} : vector<16x32xf32>, vector<32x32xf32>, vector<16x32xf32> -> vector<16x32xf32>
    %64 = vector.broadcast %57 : vector<1x32xf32> to vector<16x32xf32>
    %65 = arith.addf %64, %63 : vector<16x32xf32>
    %c144 = arith.constant 144 : index
    %c0_22 = arith.constant 0 : index
    %66 = vector.load %arg2[%c144, %c0_22] : memref<496x128xf32, #tpu.memory_space<vmem>>, vector<32x32xf32>
    %cst_23 = arith.constant dense<0.000000e+00> : vector<16x32xf32>
    %67 = tpu.matmul %8, %66, %cst_23 {dimension_numbers = #tpu.dot_dimension_numbers<[1], [0], [0], [1], [0, 0, 1, 1], [], []>} : vector<16x32xf32>, vector<32x32xf32>, vector<16x32xf32> -> vector<16x32xf32>
    %68 = arith.addf %61, %67 : vector<16x32xf32>
    %c176 = arith.constant 176 : index
    %c0_24 = arith.constant 0 : index
    %69 = vector.load %arg2[%c176, %c0_24] : memref<496x128xf32, #tpu.memory_space<vmem>>, vector<32x32xf32>
    %cst_25 = arith.constant dense<0.000000e+00> : vector<16x32xf32>
    %70 = tpu.matmul %8, %69, %cst_25 {dimension_numbers = #tpu.dot_dimension_numbers<[1], [0], [0], [1], [0, 0, 1, 1], [], []>} : vector<16x32xf32>, vector<32x32xf32>, vector<16x32xf32> -> vector<16x32xf32>
    %71 = arith.addf %65, %70 : vector<16x32xf32>
    %c208 = arith.constant 208 : index
    %c0_26 = arith.constant 0 : index
    %72 = vector.load %arg2[%c208, %c0_26] : memref<496x128xf32, #tpu.memory_space<vmem>>, vector<32x32xf32>
    %cst_27 = arith.constant dense<0.000000e+00> : vector<16x32xf32>
    %73 = tpu.matmul %55, %72, %cst_27 {dimension_numbers = #tpu.dot_dimension_numbers<[1], [0], [0], [1], [0, 0, 1, 1], [], []>} : vector<16x32xf32>, vector<32x32xf32>, vector<16x32xf32> -> vector<16x32xf32>
    %74 = arith.addf %68, %73 : vector<16x32xf32>
    %c240 = arith.constant 240 : index
    %c0_28 = arith.constant 0 : index
    %75 = vector.load %arg2[%c240, %c0_28] : memref<496x128xf32, #tpu.memory_space<vmem>>, vector<32x32xf32>
    %cst_29 = arith.constant dense<0.000000e+00> : vector<16x32xf32>
    %76 = tpu.matmul %55, %75, %cst_29 {dimension_numbers = #tpu.dot_dimension_numbers<[1], [0], [0], [1], [0, 0, 1, 1], [], []>} : vector<16x32xf32>, vector<32x32xf32>, vector<16x32xf32> -> vector<16x32xf32>
    %77 = arith.addf %71, %76 : vector<16x32xf32>
    %78 = arith.negf %77 : vector<16x32xf32>
    %79 = math.exp %78 : vector<16x32xf32>
    %cst_30 = arith.constant 1.000000e+00 : f32
    %80 = vector.broadcast %cst_30 : f32 to vector<16x32xf32>
    %81 = arith.addf %80, %79 : vector<16x32xf32>
    %82 = arith.divf %80, %81 : vector<16x32xf32>
    %83 = arith.mulf %74, %82 : vector<16x32xf32>
    %84 = arith.addf %83, %8 : vector<16x32xf32>
    %cst_31 = arith.constant 0.707106769 : f32
    %85 = vector.broadcast %cst_31 : f32 to vector<16x32xf32>
    %86 = arith.mulf %84, %85 : vector<16x32xf32>
    %c1_i32_32 = arith.constant 1 : i32
    %87 = tpu.dynamic_rotate %86 by %c1_i32_32 dim 0 : vector<16x32xf32>, i32 -> vector<16x32xf32>
    %88 = arith.mulf %87, %38 : vector<16x32xf32>
    %c15_i32_33 = arith.constant 15 : i32
    %89 = tpu.dynamic_rotate %86 by %c15_i32_33 dim 0 : vector<16x32xf32>, i32 -> vector<16x32xf32>
    %90 = arith.mulf %89, %51 : vector<16x32xf32>
    %c480 = arith.constant 480 : index
    %c0_34 = arith.constant 0 : index
    %91 = vector.load %arg2[%c480, %c0_34] : memref<496x128xf32, #tpu.memory_space<vmem>>, vector<1x32xf32>
    %c488 = arith.constant 488 : index
    %c0_35 = arith.constant 0 : index
    %92 = vector.load %arg2[%c488, %c0_35] : memref<496x128xf32, #tpu.memory_space<vmem>>, vector<1x32xf32>
    %c288 = arith.constant 288 : index
    %c0_36 = arith.constant 0 : index
    %93 = vector.load %arg2[%c288, %c0_36] : memref<496x128xf32, #tpu.memory_space<vmem>>, vector<32x32xf32>
    %cst_37 = arith.constant dense<0.000000e+00> : vector<16x32xf32>
    %94 = tpu.matmul %88, %93, %cst_37 {dimension_numbers = #tpu.dot_dimension_numbers<[1], [0], [0], [1], [0, 0, 1, 1], [], []>} : vector<16x32xf32>, vector<32x32xf32>, vector<16x32xf32> -> vector<16x32xf32>
    %95 = vector.broadcast %91 : vector<1x32xf32> to vector<16x32xf32>
    %96 = arith.addf %95, %94 : vector<16x32xf32>
    %c320 = arith.constant 320 : index
    %c0_38 = arith.constant 0 : index
    %97 = vector.load %arg2[%c320, %c0_38] : memref<496x128xf32, #tpu.memory_space<vmem>>, vector<32x32xf32>
    %cst_39 = arith.constant dense<0.000000e+00> : vector<16x32xf32>
    %98 = tpu.matmul %88, %97, %cst_39 {dimension_numbers = #tpu.dot_dimension_numbers<[1], [0], [0], [1], [0, 0, 1, 1], [], []>} : vector<16x32xf32>, vector<32x32xf32>, vector<16x32xf32> -> vector<16x32xf32>
    %99 = vector.broadcast %92 : vector<1x32xf32> to vector<16x32xf32>
    %100 = arith.addf %99, %98 : vector<16x32xf32>
    %c352 = arith.constant 352 : index
    %c0_40 = arith.constant 0 : index
    %101 = vector.load %arg2[%c352, %c0_40] : memref<496x128xf32, #tpu.memory_space<vmem>>, vector<32x32xf32>
    %cst_41 = arith.constant dense<0.000000e+00> : vector<16x32xf32>
    %102 = tpu.matmul %86, %101, %cst_41 {dimension_numbers = #tpu.dot_dimension_numbers<[1], [0], [0], [1], [0, 0, 1, 1], [], []>} : vector<16x32xf32>, vector<32x32xf32>, vector<16x32xf32> -> vector<16x32xf32>
    %103 = arith.addf %96, %102 : vector<16x32xf32>
    %c384 = arith.constant 384 : index
    %c0_42 = arith.constant 0 : index
    %104 = vector.load %arg2[%c384, %c0_42] : memref<496x128xf32, #tpu.memory_space<vmem>>, vector<32x32xf32>
    %cst_43 = arith.constant dense<0.000000e+00> : vector<16x32xf32>
    %105 = tpu.matmul %86, %104, %cst_43 {dimension_numbers = #tpu.dot_dimension_numbers<[1], [0], [0], [1], [0, 0, 1, 1], [], []>} : vector<16x32xf32>, vector<32x32xf32>, vector<16x32xf32> -> vector<16x32xf32>
    %106 = arith.addf %100, %105 : vector<16x32xf32>
    %c416 = arith.constant 416 : index
    %c0_44 = arith.constant 0 : index
    %107 = vector.load %arg2[%c416, %c0_44] : memref<496x128xf32, #tpu.memory_space<vmem>>, vector<32x32xf32>
    %cst_45 = arith.constant dense<0.000000e+00> : vector<16x32xf32>
    %108 = tpu.matmul %90, %107, %cst_45 {dimension_numbers = #tpu.dot_dimension_numbers<[1], [0], [0], [1], [0, 0, 1, 1], [], []>} : vector<16x32xf32>, vector<32x32xf32>, vector<16x32xf32> -> vector<16x32xf32>
    %109 = arith.addf %103, %108 : vector<16x32xf32>
    %c448 = arith.constant 448 : index
    %c0_46 = arith.constant 0 : index
    %110 = vector.load %arg2[%c448, %c0_46] : memref<496x128xf32, #tpu.memory_space<vmem>>, vector<32x32xf32>
    %cst_47 = arith.constant dense<0.000000e+00> : vector<16x32xf32>
    %111 = tpu.matmul %90, %110, %cst_47 {dimension_numbers = #tpu.dot_dimension_numbers<[1], [0], [0], [1], [0, 0, 1, 1], [], []>} : vector<16x32xf32>, vector<32x32xf32>, vector<16x32xf32> -> vector<16x32xf32>
    %112 = arith.addf %106, %111 : vector<16x32xf32>
    %113 = arith.negf %112 : vector<16x32xf32>
    %114 = math.exp %113 : vector<16x32xf32>
    %cst_48 = arith.constant 1.000000e+00 : f32
    %115 = vector.broadcast %cst_48 : f32 to vector<16x32xf32>
    %116 = arith.addf %115, %114 : vector<16x32xf32>
    %117 = arith.divf %115, %116 : vector<16x32xf32>
    %118 = arith.mulf %109, %117 : vector<16x32xf32>
    %119 = arith.addf %118, %86 : vector<16x32xf32>
    %cst_49 = arith.constant 0.707106769 : f32
    %120 = vector.broadcast %cst_49 : f32 to vector<16x32xf32>
    %121 = arith.mulf %119, %120 : vector<16x32xf32>
    %c40 = arith.constant 40 : index
    %c0_50 = arith.constant 0 : index
    %122 = vector.load %arg2[%c40, %c0_50] : memref<496x128xf32, #tpu.memory_space<vmem>>, vector<32x16xf32>
    %cst_51 = arith.constant dense<0.000000e+00> : vector<16x16xf32>
    %123 = tpu.matmul %121, %122, %cst_51 {dimension_numbers = #tpu.dot_dimension_numbers<[1], [0], [0], [1], [0, 0, 1, 1], [], []>} : vector<16x32xf32>, vector<32x16xf32>, vector<16x16xf32> -> vector<16x16xf32>
    %c72 = arith.constant 72 : index
    %c0_52 = arith.constant 0 : index
    %124 = vector.load %arg2[%c72, %c0_52] : memref<496x128xf32, #tpu.memory_space<vmem>>, vector<1x16xf32>
    %125 = vector.broadcast %124 : vector<1x16xf32> to vector<16x16xf32>
    %126 = arith.addf %123, %125 : vector<16x16xf32>
    %127 = arith.addf %126, %3 : vector<16x16xf32>
    %cst_53 = arith.constant 0.707106769 : f32
    %128 = vector.broadcast %cst_53 : f32 to vector<16x16xf32>
    %129 = arith.mulf %127, %128 : vector<16x16xf32>
    %130 = tpu.concatenate %126, %129 in 1 : vector<16x16xf32>, vector<16x16xf32> -> vector<16x32xf32>
    %c0_54 = arith.constant 0 : index
    %c0_55 = arith.constant 0 : index
    %131 = vector.load %arg3[%c0_54, %c0_55] : memref<16x32xf32, #tpu.memory_space<vmem>>, vector<16x32xf32>
    tpu.vector_store %arg3[%c0_54, %c0_55], %130 {strides = array<i32>} : memref<16x32xf32, #tpu.memory_space<vmem>>, vector<16x32xf32>,
    return
  }
  func.func @transform_0(%arg0: i32) -> (i32, i32) {
    %c0_i32 = arith.constant 0 : i32
    %c0_i32_0 = arith.constant 0 : i32
    %c0_i32_1 = arith.constant 0 : i32
    return %c0_i32, %c0_i32_0 : i32, i32
  }
  func.func @transform_1(%arg0: i32) -> (i32, i32) {
    %c0_i32 = arith.constant 0 : i32
    %c0_i32_0 = arith.constant 0 : i32
    %c0_i32_1 = arith.constant 0 : i32
    return %c0_i32, %c0_i32_0 : i32, i32
  }
  func.func @transform_2(%arg0: i32) -> (i32, i32) {
    %c0_i32 = arith.constant 0 : i32
    %c0_i32_0 = arith.constant 0 : i32
    %c0_i32_1 = arith.constant 0 : i32
    return %c0_i32, %c0_i32_0 : i32, i32
  }
}

</mosaic_0001>

<bundles_post_ra>
// kernel: encoder_forward.1
= control target key start
LH: loop header
LB: loop body
LE: loop exit
PB: predicated region body
PF: predicated region fallthrough
CT: control target
= control target key end

     0   :  { %7 = vsyncpa [#allocation3], 0  ;;  %s1869_s0 = inlined_call_operand.hbm [shape: f32[16,16], index: 0, kind: input, shape index: {}]   ;;  %s1870_s1 = inlined_call_operand.hbm [shape: f32[496,128], index: 1, kind: input, shape index: {}]   ;;  %s1871_s2 = inlined_call_operand.vmem [shape: f32[16,32], index: 2, kind: output, shape index: {}]  }
   0x1   :  { %8 = vsyncpa [#allocation5], 0  ;;  %s1730_s9 = smov [#allocation2]  }
   0x2   :  { %s14_s10 = sshll.u32 %s1730_s9, 4  ;;  %s15_s10 = int_to_ptr.vmem [resolvable:$true] %s14_s10 }
   0x3   :  { %s1694_s11 = scalar_lea.vmem %s15_s10, 256  ;;  %p1699_p1 = scmp.lt.s32.totalorder %s15_s10, %s15_s10 }
   0x4   :  { %p1695_p0 = scmp.ne.s32.totalorder %s15_s10, %s1694_s11  ;;  %p1700_p2 = scmp.lt.s32.totalorder %s1694_s11, %s1694_s11 }
   0x6   :  { %p1701_p3 = por %p1700_p2, %p1699_p1 }
   0x8   :  { %p1702_p4 = pnand %p1701_p3, %p1695_p0 }
   0xa   :  { %1705 = shalt.err (!%p1702_p4)
}
   0xb   :  { %s1731_s12 = smov 128   ;;  %s1732_s13 = smov 8  }
   0xc   :  { %20 = dma.hbm_to_vmem [thread:$0]  %s1869_s0, 256, %s15_s10, [#allocation3], %s1731_s12, %s1731_s12, %s1732_s13  }
   0xd   :  { %s1733_s16 = smov [#allocation4]  }
   0xe   :  { %s26_s17 = sshll.u32 %s1733_s16, 4  ;;  %s27_s17 = int_to_ptr.vmem [resolvable:$true] %s26_s17 }
   0xf   :  { %s1714_s18 = scalar_lea.vmem %s27_s17, 7936  ;;  %p1719_p6 = scmp.lt.s32.totalorder %s27_s17, %s27_s17 }
  0x10   :  { %p1715_p5 = scmp.ne.s32.totalorder %s27_s17, %s1714_s18  ;;  %p1720_p7 = scmp.lt.s32.totalorder %s1714_s18, %s1714_s18 }
  0x12   :  { %p1721_p8 = por %p1720_p7, %p1719_p6 }
  0x14   :  { %p1722_p9 = pnand %p1721_p8, %p1715_p5 }
  0x16   :  { %1725 = shalt.err (!%p1722_p9)
}
  0x17   :  { %32 = dma.hbm_to_vmem [thread:$0]  %s1870_s1, 7936, %s27_s17, [#allocation5], %s1731_s12, %s1731_s12, %s1732_s13  }
  0x18   :  { %1726 = dma.done.wait [#allocation3], 256  }
  0x19   :  { %1727 = vsyncadd [#allocation3], 4294967040 }
  0x1a   :  { %1728 = dma.done.wait [#allocation5], 7936  }
  0x1b   :  { %1729 = vsyncadd [#allocation5], 4294959360  ;;  %v48_v0 = vld [vmem:[#allocation4 + $0x18] sm:$0xff]  ;;  %v47_v1 = vld [vmem:[#allocation4 + $0x10] sm:$0xff]  ;;  %vm54_vm0 = vcmask 130048   ;;  %v136_v20 = vlaneseq  ;;  %v1734_v32 = vmov 0.0  }
  0x1c   :  { %v39_v2 = vld [vmem:[#allocation2] sm:$0xff]  ;;  %1514 = vmatprep.subr.mxu0 %v48_v0  ;;  %v43_v4 = vld [vmem:[#allocation4] sm:$0xff]  ;;  %v40_v5 = vld [vmem:[#allocation2 + $0x8] sm:$0xff]  ;;  %vm207_vm4 = vcmask 261120   ;;  %s1735_s0 = smov 16  }
  0x1d   :  { %v41_v3 = vadd.f32 %v39_v2, %v39_v2  ;;  %v44_v6 = vld [vmem:[#allocation4 + $0x8] sm:$0xff]  ;;  %1515 = vmatpush3.msra.mxu0 %v48_v0  ;;  %v42_v7 = vadd.f32 %v40_v5, %v40_v5  ;;  %v205_v12 = vld [vmem:[#allocation4 + $0x60] sm:$0xff]  ;;  %v204_v14 = vld [vmem:[#allocation4 + $0x58] sm:$0xff]  ;;  %v1765_v21 = vshrl.u32 %v136_v20, 7 }
  0x1e   :  { %1516 = vmatprep.subr.mxu0 %v47_v1  ;;  %v206_v10 = vld [vmem:[#allocation4 + $0x68] sm:$0xff]  ;;  %v297_v13 = vld [vmem:[#allocation4 + $0x80] sm:$0xff]  ;;  %v296_v15 = vld [vmem:[#allocation4 + $0x78] sm:$0xff] }
  0x1f   :  { %v1757_v8 = vadd.f32 %v43_v4, %v41_v3  ;;  %1517 = vmatpush3.msra.mxu0 %v47_v1  ;;  %v1759_v9 = vadd.f32 %v44_v6, %v42_v7  ;;  %v298_v11 = vld [vmem:[#allocation4 + $0x88] sm:$0xff]  ;;  %1521 = vmatprep.subr.mxu1 %v206_v10  ;;  %v203_v16 = vld [vmem:[#allocation4 + $0x50] sm:$0xff]  ;;  %v138_v22 = vadd.s32 8, %v1765_v21  ;;  %v143_v23 = vand.u32 7, %v1765_v21  ;;  %v1390_v25 = vld [vmem:[#allocation4 + $0x20] ss:$0 sm:$0xff] }
  0x20   :  { %1532 = vmatprep.subr.mxu0 %v298_v11  ;;  %1522 = vmatpush3.msra.mxu1 %v206_v10  ;;  %v295_v17 = vld [vmem:[#allocation4 + $0x70] sm:$0xff]  ;;  %v383_v18 = vld [vmem:[#allocation4 + $0xa8] sm:$0xff]  ;;  %vm189_vm3 = vcmp.lt.s32.totalorder %v1765_v21, 1  ;;  %v382_v42 = vld [vmem:[#allocation4 + $0xa0] sm:$0xff]  ;;  %vm196_vm6 = vcmp.lt.s32.totalorder %v1765_v21, 7 }
  0x21   :  { %1518 = vmatprep.mubr.msk.f32.mxu0 %vm54_vm0, %v1757_v8  ;;  %1523 = vmatprep.subr.mxu1 %v205_v12  ;;  %v470_v19 = vld [vmem:[#allocation4 + $0xc8] sm:$0xff]  ;;  %v150_v24 = vand.u32 7, %v138_v22  ;;  %v163_v26 = vadd.s32 4294967295, %v143_v23  ;;  %v175_v41 = vadd.s32 1, %v143_v23  ;;  %v469_v43 = vld [vmem:[#allocation4 + $0xc0] sm:$0xff]  ;;  %v381_v45 = vld [vmem:[#allocation4 + $0x98] sm:$0xff] }
  0x22   :  { %1519 = vmatmul.mubr.msk.f32.vlgmr.msra.gmra.mxu0 %vm54_vm0, %v1759_v9  ;;  %1524 = vmatpush3.msra.mxu1 %v205_v12  ;;  %v468_v46 = vld [vmem:[#allocation4 + $0xb8] sm:$0xff]  ;;  %v380_v48 = vld [vmem:[#allocation4 + $0x90] sm:$0xff]  ;;  %v551_v53 = vld [vmem:[#allocation4 + $0xe8] sm:$0xff] }
  0x23   :  { %1533 = vmatpush3.msra.mxu0 %v298_v11  ;;  %1525 = vmatprep.subr.mxu1 %v204_v14  ;;  %v164_v27 = vadd.s32 4294967295, %v150_v24  ;;  %vm165_vm1 = vcmp.ge.s32.totalorder %v163_v26, 0  ;;  %vm179_vm5 = vcmp.lt.s32.totalorder %v175_v41, 8  ;;  %v467_v49 = vld [vmem:[#allocation4 + $0xb0] sm:$0xff]  ;;  %v176_v52 = vadd.s32 1, %v150_v24  ;;  %v638_v54 = vld [vmem:[#allocation4 + $0x108] sm:$0xff] }
  0x24   :  { %1534 = vmatprep.subr.mxu0 %v297_v13  ;;  %1526 = vmatpush3.msra.mxu1 %v204_v14  ;;  %v1774_v33 = vsel %vm165_vm1, 1.0, %v1734_v32  ;;  %v1797_v50 = vsel %vm179_vm5, 1.0, %v1734_v32  ;;  %v550_v56 = vld [vmem:[#allocation4 + $0xe0] sm:$0xff]  ;;  %v549_v58 = vld [vmem:[#allocation4 + $0xd8] sm:$0xff]  ;;  %v548_v62 = vld [vmem:[#allocation4 + $0xd0] sm:$0xff] }
  0x25   :  { %1535 = vmatpush3.msra.mxu0 %v297_v13  ;;  %1527 = vmatprep.subr.mxu1 %v203_v16  ;;  %vm166_vm2 = vcmp.ge.s32.totalorder %v164_v27, 0  ;;  %v637_v57 = vld [vmem:[#allocation4 + $0x100] sm:$0xff]  ;;  %vm180_vm7 = vcmp.lt.s32.totalorder %v176_v52, 8  ;;  %v636_v59 = vld [vmem:[#allocation4 + $0xf8] sm:$0xff]  ;;  %v635_v63 = vld [vmem:[#allocation4 + $0xf0] sm:$0xff] }
  0x26   :  { %1536 = vmatprep.subr.mxu0 %v296_v15  ;;  %1528 = vmatpush3.msra.mxu1 %v203_v16  ;;  %v1778_v36 = vsel %vm166_vm2, 1.0, %v1734_v32  ;;  %v1808_v60 = vsel %vm180_vm7, 1.0, %v1734_v32  ;;  %v751_v1 = vld [vmem:[#allocation4 + $0x138] sm:$0xff]  ;;  %v750_v3 = vld [vmem:[#allocation4 + $0x130] sm:$0xff]  ;;  %v749_v5 = vld [vmem:[#allocation4 + $0x128] sm:$0xff] }
  0x27   :  { %1537 = vmatpush3.msra.mxu0 %v296_v15  ;;  %1543 = vmatprep.subr.mxu1 %v383_v18  ;;  %v842_v2 = vld [vmem:[#allocation4 + $0x158] sm:$0xff]  ;;  %v841_v4 = vld [vmem:[#allocation4 + $0x150] sm:$0xff]  ;;  %v840_v6 = vld [vmem:[#allocation4 + $0x148] sm:$0xff] }
  0x28   :  { %1538 = vmatprep.subr.mxu0 %v295_v17  ;;  %v748_v7 = vld [vmem:[#allocation4 + $0x120] sm:$0xff]  ;;  %v927_v11 = vld [vmem:[#allocation4 + $0x178] sm:$0xff]  ;;  %v1279_v21 = vld [vmem:[#allocation4 + $0x30] sm:$0xff] }
  0x29   :  { %1539 = vmatpush3.msra.mxu0 %v295_v17  ;;  %v839_v10 = vld [vmem:[#allocation4 + $0x140] sm:$0xff]  ;;  %v1014_v12 = vld [vmem:[#allocation4 + $0x198] sm:$0xff] }
  0x2a   :  { %1554 = vmatprep.subr.mxu0 %v470_v19  ;;  %v1402_v15 = vld [vmem:[#allocation4 + $0x118] ss:$0 sm:$0xff] }
  0xe2   :  { %v1520_v28 = vpop.f32.mrf.mxu0 }
  0xe3   :  { %v1769_v29 = vadd.f32 %v1520_v28, %v1390_v25 }
  0xe4   :  { %v127_v30 = vpop.f32.mrf.mxu0 }
  0xe5   :  { %v1771_v31 = vadd.f32 %v1390_v25, %v127_v30  ;;  %v188_v35 = vrot.slane %v1769_v29, 7  ;;  %v195_v47 = vrot.slane %v1769_v29, 1 }
  0xe7   :  { %v187_v34 = vrot.slane %v1771_v31, 7  ;;  %v194_v44 = vrot.slane %v1771_v31, 1 }
  0xe9   :  { %v191_v37 = vsel %vm189_vm3, %v188_v35, %v187_v34  ;;  %v190_v38 = vsel %vm189_vm3, %v187_v34, %v188_v35  ;;  %v197_v51 = vsel %vm196_vm6, %v194_v44, %v195_v47  ;;  %v198_v61 = vsel %vm196_vm6, %v195_v47, %v194_v44 }
  0xea   :  { %v192_v39 = vmul.f32 %v1774_v33, %v191_v37  ;;  %v193_v40 = vmul.f32 %v1778_v36, %v190_v38  ;;  %v199_v55 = vmul.f32 %v1797_v50, %v197_v51  ;;  %v200_v0 = vmul.f32 %v1808_v60, %v198_v61 }
  0xec   :  { %1529 = vmatprep.mubr.msk.f32.mxu1 %vm207_vm4, %v192_v39  ;;  %1540 = vmatprep.mubr.msk.f32.mxu0 %vm207_vm4, %v192_v39 }
  0xed   :  { %1530 = vmatmul.mubr.msk.f32.vlgmr.msra.gmra.mxu1 %vm207_vm4, %v193_v40  ;;  %1541 = vmatmul.mubr.msk.f32.vlgmr.msra.gmra.mxu0 %vm207_vm4, %v193_v40  ;;  %v1399_v40 = vld [vmem:[#allocation4 + $0x110] ss:$0 sm:$0xff] }
  0xee   :  { %1544 = vmatpush3.msra.mxu1 %v383_v18  ;;  %1555 = vmatpush3.msra.mxu0 %v470_v19 }
  0xef   :  { %1545 = vmatprep.subr.mxu1 %v382_v42  ;;  %1551 = vmatprep.mubr.msk.f32.mxu1 %vm207_vm4, %v1771_v31 }
  0xf0   :  { %1556 = vmatprep.subr.mxu0 %v469_v43  ;;  %1562 = vmatprep.mubr.msk.f32.mxu0 %vm207_vm4, %v1771_v31 }
  0xf1   :  { %1546 = vmatpush3.msra.mxu1 %v382_v42  ;;  %1557 = vmatpush3.msra.mxu0 %v469_v43 }
  0xf2   :  { %1547 = vmatprep.subr.mxu1 %v381_v45  ;;  %1558 = vmatprep.subr.mxu0 %v468_v46 }
  0xf3   :  { %1548 = vmatpush3.msra.mxu1 %v381_v45  ;;  %1559 = vmatpush3.msra.mxu0 %v468_v46 }
  0xf4   :  { %1549 = vmatprep.subr.mxu1 %v380_v48  ;;  %1560 = vmatprep.subr.mxu0 %v467_v49 }
  0xf5   :  { %1550 = vmatpush3.msra.mxu1 %v380_v48  ;;  %1561 = vmatpush3.msra.mxu0 %v467_v49 }
  0xf6   :  { %1552 = vmatmul.mubr.msk.f32.vlgmr.msra.gmra.mxu1 %vm207_vm4, %v1769_v29  ;;  %1563 = vmatmul.mubr.msk.f32.vlgmr.msra.gmra.mxu0 %vm207_vm4, %v1769_v29 }
  0xf7   :  { %1565 = vmatprep.subr.mxu1 %v551_v53  ;;  %1576 = vmatprep.subr.mxu0 %v638_v54 }
  0xf8   :  { %1566 = vmatpush3.msra.mxu1 %v551_v53  ;;  %1573 = vmatprep.mubr.msk.f32.mxu1 %vm207_vm4, %v199_v55 }
  0xf9   :  { %1577 = vmatpush3.msra.mxu0 %v638_v54  ;;  %1584 = vmatprep.mubr.msk.f32.mxu0 %vm207_vm4, %v199_v55 }
  0xfa   :  { %1567 = vmatprep.subr.mxu1 %v550_v56  ;;  %1578 = vmatprep.subr.mxu0 %v637_v57 }
  0xfb   :  { %1568 = vmatpush3.msra.mxu1 %v550_v56  ;;  %1579 = vmatpush3.msra.mxu0 %v637_v57 }
  0xfc   :  { %1569 = vmatprep.subr.mxu1 %v549_v58  ;;  %1580 = vmatprep.subr.mxu0 %v636_v59 }
  0xfd   :  { %1570 = vmatpush3.msra.mxu1 %v549_v58  ;;  %1581 = vmatpush3.msra.mxu0 %v636_v59 }
  0xfe   :  { %1571 = vmatprep.subr.mxu1 %v548_v62  ;;  %1582 = vmatprep.subr.mxu0 %v635_v63 }
  0xff   :  { %1572 = vmatpush3.msra.mxu1 %v548_v62  ;;  %1583 = vmatpush3.msra.mxu0 %v635_v63 }
 0x100   :  { %1574 = vmatmul.mubr.msk.f32.vlgmr.msra.gmra.mxu1 %vm207_vm4, %v200_v0  ;;  %1585 = vmatmul.mubr.msk.f32.vlgmr.msra.gmra.mxu0 %vm207_vm4, %v200_v0 }
 0x101   :  { %1587 = vmatprep.subr.mxu1 %v751_v1  ;;  %1598 = vmatprep.subr.mxu0 %v842_v2 }
 0x102   :  { %1588 = vmatpush3.msra.mxu1 %v751_v1  ;;  %1599 = vmatpush3.msra.mxu0 %v842_v2  ;;  %v1013_v1 = vld [vmem:[#allocation4 + $0x190] sm:$0xff]  ;;  %v925_v2 = vld [vmem:[#allocation4 + $0x168] sm:$0xff] }
 0x103   :  { %1589 = vmatprep.subr.mxu1 %v750_v3  ;;  %1600 = vmatprep.subr.mxu0 %v841_v4 }
 0x104   :  { %1590 = vmatpush3.msra.mxu1 %v750_v3  ;;  %1601 = vmatpush3.msra.mxu0 %v841_v4  ;;  %v924_v3 = vld [vmem:[#allocation4 + $0x160] sm:$0xff] }
 0x105   :  { %1591 = vmatprep.subr.mxu1 %v749_v5  ;;  %1602 = vmatprep.subr.mxu0 %v840_v6  ;;  %v1011_v4 = vld [vmem:[#allocation4 + $0x180] sm:$0xff] }
 0x106   :  { %1592 = vmatpush3.msra.mxu1 %v749_v5  ;;  %1603 = vmatpush3.msra.mxu0 %v840_v6 }
 0x107   :  { %1593 = vmatprep.subr.mxu1 %v748_v7  ;;  %1604 = vmatprep.subr.mxu0 %v839_v10 }
 0x108   :  { %1594 = vmatpush3.msra.mxu1 %v748_v7  ;;  %1605 = vmatpush3.msra.mxu0 %v839_v10  ;;  %v1095_v7 = vld [vmem:[#allocation4 + $0x1b8] sm:$0xff] }
 0x109   :  { %1609 = vmatprep.subr.mxu1 %v927_v11  ;;  %1620 = vmatprep.subr.mxu0 %v1014_v12  ;;  %v1182_v10 = vld [vmem:[#allocation4 + $0x1d8] sm:$0xff] }
 0x1ad   :  { %v1542_v13 = vpop.f32.mrf.mxu0  ;;  %v1531_v30 = vpop.f32.mrf.mxu1 }
 0x1ae   :  { %v379_v17 = vadd.f32 %v1542_v13, %v1402_v15  ;;  %v294_v43 = vadd.f32 %v1531_v30, %v1399_v40  ;;  %v1181_v13 = vld [vmem:[#allocation4 + $0x1d0] sm:$0xff] }
 0x1af   :  { %v365_v14 = vpop.f32.mrf.mxu0  ;;  %v280_v37 = vpop.f32.mrf.mxu1 }
 0x1b0   :  { %v378_v19 = vadd.f32 %v1402_v15, %v365_v14  ;;  %v293_v44 = vadd.f32 %v1399_v40, %v280_v37  ;;  %v1093_v14 = vld [vmem:[#allocation4 + $0x1a8] sm:$0xff] }
 0x1b1   :  { %v1180_v15 = vld [vmem:[#allocation4 + $0x1c8] sm:$0xff] }
 0x1b6   :  { %v1564_v16 = vpop.f32.mrf.mxu0  ;;  %v1553_v39 = vpop.f32.mrf.mxu1 }
 0x1b7   :  { %v547_v20 = vadd.f32 %v1564_v16, %v379_v17  ;;  %v466_v45 = vadd.f32 %v1553_v39, %v294_v43  ;;  %v1092_v16 = vld [vmem:[#allocation4 + $0x1a0] sm:$0xff] }
 0x1b8   :  { %v537_v18 = vpop.f32.mrf.mxu0  ;;  %v456_v41 = vpop.f32.mrf.mxu1  ;;  %v1179_v17 = vld [vmem:[#allocation4 + $0x1c0] sm:$0xff] }
 0x1b9   :  { %v546_v23 = vadd.f32 %v537_v18, %v378_v19  ;;  %v465_v47 = vadd.f32 %v456_v41, %v293_v44  ;;  %v1281_v19 = vld [vmem:[#allocation4 + $0x40] sm:$0xff] }
 0x1c0   :  { %v1586_v22 = vpop.f32.mrf.mxu0  ;;  %v1575_v42 = vpop.f32.mrf.mxu1 }
 0x1c1   :  { %v715_v24 = vadd.f32 %v1586_v22, %v547_v20  ;;  %v634_v48 = vadd.f32 %v1575_v42, %v466_v45  ;;  %v1280_v20 = vld [vmem:[#allocation4 + $0x38] sm:$0xff]  ;;  %v1278_v22 = vld [vmem:[#allocation4 + $0x28] sm:$0xff] }
 0x1c2   :  { %v705_v25 = vpop.f32.mrf.mxu0  ;;  %v624_v46 = vpop.f32.mrf.mxu1 }
 0x1c3   :  { %v1412_v26 = vmul.f32 -1.442695, %v715_v24  ;;  %v714_v27 = vadd.f32 %v705_v25, %v546_v23  ;;  %v633_v52 = vadd.f32 %v624_v46, %v465_v47  ;;  %v1418_v24 = vld [vmem:[#allocation4 + $0x1e8] ss:$0 sm:$0xff] }
 0x1c5   :  { %1670 = vpow2.f32 %v1412_v26  ;;  %v1411_v28 = vmul.f32 -1.442695, %v714_v27 }
 0x1c7   :  { %1672 = vpow2.f32 %v1411_v28 }
 0x1d2   :  { %v1671_v32 = vpop.eup %1670 }
 0x1d3   :  { %v723_v34 = vadd.f32 1.0, %v1671_v32 }
 0x1d4   :  { %v1673_v35 = vpop.eup %1672 }
 0x1d5   :  { %1674 = vrcp.f32 %v723_v34  ;;  %v722_v38 = vadd.f32 1.0, %v1673_v35 }
 0x1d7   :  { %1676 = vrcp.f32 %v722_v38 }
 0x1e2   :  { %v1675_v49 = vpop.eup %1674 }
 0x1e3   :  { %v729_v51 = vmul.f32 %v1675_v49, %v634_v48  ;;  %v1415_v48 = vld [vmem:[#allocation4 + $0x1e0] ss:$0 sm:$0xff] }
 0x1e4   :  { %v1677_v53 = vpop.eup %1676 }
 0x1e5   :  { %v731_v54 = vadd.f32 %v729_v51, %v1769_v29  ;;  %v728_v55 = vmul.f32 %v1677_v53, %v633_v52 }
 0x1e7   :  { %v1816_v56 = vmul.f32 0.70710677, %v731_v54  ;;  %v730_v57 = vadd.f32 %v728_v55, %v1771_v31  ;;  %v926_v31 = vld [vmem:[#allocation4 + $0x170] sm:$0xff] }
 0x1e9   :  { %v1819_v58 = vmul.f32 0.70710677, %v730_v57  ;;  %v735_v61 = vrot.slane %v1816_v56, 7  ;;  %v741_v5 = vrot.slane %v1816_v56, 1 }
 0x1eb   :  { %v734_v59 = vrot.slane %v1819_v58, 7 }
 0x1ed   :  { %v737_v62 = vsel %vm189_vm3, %v735_v61, %v734_v59  ;;  %v736_v63 = vsel %vm189_vm3, %v734_v59, %v735_v61 }
 0x1ee   :  { %v738_v0 = vmul.f32 %v1774_v33, %v737_v62  ;;  %v739_v29 = vmul.f32 %v1778_v36, %v736_v63  ;;  %v1012_v33 = vld [vmem:[#allocation4 + $0x188] sm:$0xff]  ;;  %v740_v36 = vrot.slane %v1819_v58, 1 }
 0x1f0   :  { %1595 = vmatprep.mubr.msk.f32.mxu1 %vm207_vm4, %v738_v0  ;;  %1606 = vmatprep.mubr.msk.f32.mxu0 %vm207_vm4, %v738_v0  ;;  %v742_v6 = vsel %vm196_vm6, %v740_v36, %v741_v5 }
 0x1f1   :  { %1596 = vmatmul.mubr.msk.f32.vlgmr.msra.gmra.mxu1 %vm207_vm4, %v739_v29  ;;  %1607 = vmatmul.mubr.msk.f32.vlgmr.msra.gmra.mxu0 %vm207_vm4, %v739_v29 }
 0x1f2   :  { %1610 = vmatpush3.msra.mxu1 %v927_v11  ;;  %1621 = vmatpush3.msra.mxu0 %v1014_v12  ;;  %v744_v11 = vmul.f32 %v1797_v50, %v742_v6  ;;  %v1094_v12 = vld [vmem:[#allocation4 + $0x1b0] sm:$0xff]  ;;  %v743_v50 = vsel %vm196_vm6, %v741_v5, %v740_v36 }
 0x1f3   :  { %1611 = vmatprep.subr.mxu1 %v926_v31  ;;  %1617 = vmatprep.mubr.msk.f32.mxu1 %vm207_vm4, %v1819_v58  ;;  %v745_v18 = vmul.f32 %v1808_v60, %v743_v50 }
 0x1f4   :  { %1622 = vmatprep.subr.mxu0 %v1013_v1  ;;  %1628 = vmatprep.mubr.msk.f32.mxu0 %vm207_vm4, %v1819_v58 }
 0x1f5   :  { %1612 = vmatpush3.msra.mxu1 %v926_v31  ;;  %1623 = vmatpush3.msra.mxu0 %v1013_v1 }
 0x1f6   :  { %1613 = vmatprep.subr.mxu1 %v925_v2  ;;  %1624 = vmatprep.subr.mxu0 %v1012_v33 }
 0x1f7   :  { %1614 = vmatpush3.msra.mxu1 %v925_v2  ;;  %1625 = vmatpush3.msra.mxu0 %v1012_v33 }
 0x1f8   :  { %1615 = vmatprep.subr.mxu1 %v924_v3  ;;  %1626 = vmatprep.subr.mxu0 %v1011_v4 }
 0x1f9   :  { %1616 = vmatpush3.msra.mxu1 %v924_v3  ;;  %1627 = vmatpush3.msra.mxu0 %v1011_v4  ;;  %v1429_v3 = vld [vmem:[#allocation4 + $0x48] ss:$0 sm:$0xff] }
 0x1fa   :  { %1618 = vmatmul.mubr.msk.f32.vlgmr.msra.gmra.mxu1 %vm207_vm4, %v1816_v56  ;;  %1629 = vmatmul.mubr.msk.f32.vlgmr.msra.gmra.mxu0 %vm207_vm4, %v1816_v56 }
 0x1fb   :  { %1631 = vmatprep.subr.mxu1 %v1095_v7  ;;  %1642 = vmatprep.subr.mxu0 %v1182_v10 }
 0x1fc   :  { %1632 = vmatpush3.msra.mxu1 %v1095_v7  ;;  %1639 = vmatprep.mubr.msk.f32.mxu1 %vm207_vm4, %v744_v11 }
 0x1fd   :  { %1643 = vmatpush3.msra.mxu0 %v1182_v10  ;;  %1650 = vmatprep.mubr.msk.f32.mxu0 %vm207_vm4, %v744_v11 }
 0x1fe   :  { %1633 = vmatprep.subr.mxu1 %v1094_v12  ;;  %1644 = vmatprep.subr.mxu0 %v1181_v13 }
 0x1ff   :  { %1634 = vmatpush3.msra.mxu1 %v1094_v12  ;;  %1645 = vmatpush3.msra.mxu0 %v1181_v13 }
 0x200   :  { %1635 = vmatprep.subr.mxu1 %v1093_v14  ;;  %1646 = vmatprep.subr.mxu0 %v1180_v15 }
 0x201   :  { %1636 = vmatpush3.msra.mxu1 %v1093_v14  ;;  %1647 = vmatpush3.msra.mxu0 %v1180_v15 }
 0x202   :  { %1637 = vmatprep.subr.mxu1 %v1092_v16  ;;  %1648 = vmatprep.subr.mxu0 %v1179_v17 }
 0x203   :  { %1638 = vmatpush3.msra.mxu1 %v1092_v16  ;;  %1649 = vmatpush3.msra.mxu0 %v1179_v17 }
 0x204   :  { %1640 = vmatmul.mubr.msk.f32.vlgmr.msra.gmra.mxu1 %vm207_vm4, %v745_v18  ;;  %1651 = vmatmul.mubr.msk.f32.vlgmr.msra.gmra.mxu0 %vm207_vm4, %v745_v18 }
 0x205   :  { %1653 = vmatprep.subr.mxu1 %v1281_v19 }
 0x206   :  { %1654 = vmatpush3.msra.mxu1 %v1281_v19 }
 0x207   :  { %1655 = vmatprep.subr.mxu1 %v1280_v20 }
 0x208   :  { %1656 = vmatpush3.msra.mxu1 %v1280_v20 }
 0x209   :  { %1657 = vmatprep.subr.mxu1 %v1279_v21 }
 0x20a   :  { %1658 = vmatpush3.msra.mxu1 %v1279_v21 }
 0x20b   :  { %1659 = vmatprep.subr.mxu1 %v1278_v22 }
 0x20c   :  { %1660 = vmatpush3.msra.mxu1 %v1278_v22 }
 0x2b1   :  { %v1608_v23 = vpop.f32.mrf.mxu0  ;;  %v1597_v41 = vpop.f32.mrf.mxu1 }
 0x2b2   :  { %v923_v26 = vadd.f32 %v1608_v23, %v1418_v24  ;;  %v838_v52 = vadd.f32 %v1597_v41, %v1415_v48 }
 0x2b3   :  { %v909_v60 = vpop.f32.mrf.mxu0  ;;  %v824_v45 = vpop.f32.mrf.mxu1 }
 0x2b4   :  { %v922_v28 = vadd.f32 %v1418_v24, %v909_v60  ;;  %v837_v53 = vadd.f32 %v1415_v48, %v824_v45 }
 0x2ba   :  { %v1630_v25 = vpop.f32.mrf.mxu0  ;;  %v1619_v47 = vpop.f32.mrf.mxu1 }
 0x2bb   :  { %v1091_v30 = vadd.f32 %v1630_v25, %v923_v26  ;;  %v1010_v54 = vadd.f32 %v1619_v47, %v838_v52 }
 0x2bc   :  { %v1081_v27 = vpop.f32.mrf.mxu0  ;;  %v1000_v49 = vpop.f32.mrf.mxu1 }
 0x2bd   :  { %v1090_v34 = vadd.f32 %v1081_v27, %v922_v28  ;;  %v1009_v57 = vadd.f32 %v1000_v49, %v837_v53 }
 0x2c4   :  { %v1652_v32 = vpop.f32.mrf.mxu0  ;;  %v1641_v51 = vpop.f32.mrf.mxu1 }
 0x2c5   :  { %v1259_v35 = vadd.f32 %v1652_v32, %v1091_v30  ;;  %v1178_v59 = vadd.f32 %v1641_v51, %v1010_v54 }
 0x2c6   :  { %v1249_v37 = vpop.f32.mrf.mxu0  ;;  %v1168_v55 = vpop.f32.mrf.mxu1 }
 0x2c7   :  { %v1428_v38 = vmul.f32 -1.442695, %v1259_v35  ;;  %v1258_v39 = vadd.f32 %v1249_v37, %v1090_v34  ;;  %v1177_v62 = vadd.f32 %v1168_v55, %v1009_v57 }
 0x2c9   :  { %1678 = vpow2.f32 %v1428_v38  ;;  %v1427_v40 = vmul.f32 -1.442695, %v1258_v39 }
 0x2cb   :  { %1680 = vpow2.f32 %v1427_v40 }
 0x2d6   :  { %v1679_v42 = vpop.eup %1678 }
 0x2d7   :  { %v1267_v43 = vadd.f32 1.0, %v1679_v42 }
 0x2d8   :  { %v1681_v44 = vpop.eup %1680 }
 0x2d9   :  { %1682 = vrcp.f32 %v1267_v43  ;;  %v1266_v46 = vadd.f32 1.0, %v1681_v44 }
 0x2db   :  { %1684 = vrcp.f32 %v1266_v46 }
 0x2e6   :  { %v1683_v61 = vpop.eup %1682 }
 0x2e7   :  { %v1273_v63 = vmul.f32 %v1683_v61, %v1178_v59 }
 0x2e8   :  { %v1685_v0 = vpop.eup %1684 }
 0x2e9   :  { %v1272_v29 = vmul.f32 %v1685_v0, %v1177_v62  ;;  %v1275_v31 = vadd.f32 %v1273_v63, %v1816_v56 }
 0x2eb   :  { %v1274_v1 = vadd.f32 %v1272_v29, %v1819_v58  ;;  %v1277_v33 = vmul.f32 0.70710677, %v1275_v31 }
 0x2ed   :  { %v1276_v2 = vmul.f32 0.70710677, %v1274_v1 }
 0x2ef   :  { %1661 = vmatprep.mubr.msk.f32.mxu1 %vm207_vm4, %v1276_v2 }
 0x2f0   :  { %1662 = vmatmul.mubr.msk.f32.vlgmr.msra.gmra.mxu1 %vm207_vm4, %v1277_v33 }
 0x3b0   :  { %v1663_v36 = vpop.f32.mrf.mxu1 }
 0x3b1   :  { %v1365_v5 = vadd.f32 %v1663_v36, %v1429_v3 }
 0x3b2   :  { %v1359_v4 = vpop.f32.mrf.mxu1 }
 0x3b3   :  { %v1360_v6 = vadd.f32 %v1429_v3, %v1359_v4  ;;  %v1369_v10 = vadd.f32 %v1365_v5, %v1759_v9 }
 0x3b5   :  { %v1368_v7 = vadd.f32 %v1360_v6, %v1757_v8  ;;  %v1371_v56 = vmul.f32 0.70710677, %v1369_v10 }
 0x3b7   :  { %v1370_v11 = vmul.f32 0.70710677, %v1368_v7 }
 0x3b9   :  { %1374 = vrot.lane.b32.xlu0 %v1370_v11, %s1735_s0 }
 0x3bd   :  { %1376 = vrot.lane.b32.xlu0 %v1371_v56, %s1735_s0 }
 0x42b   :  { %v1375_v58 = vpop.permute.xlu0 %1374 }
 0x42c   :  { %v1380_v12 = vsel %vm54_vm0, %v1360_v6, %v1375_v58 }
 0x42d   :  { %1382 = vst.msk [vmem:[%s1871_s2] sm:$0xff] %vm207_vm4, %v1380_v12 }
 0x42f   :  { %v1377_v13 = vpop.permute.xlu0 %1376 }
 0x430   :  { %v1381_v14 = vsel %vm54_vm0, %v1365_v5, %v1377_v13 }
 0x431   :  { %1383 = vst.msk [vmem:[%s1871_s2 + $0x8] sm:$0xff] %vm207_vm4, %v1381_v14 }
 0x432   :  { %1388 = vsyncpa [#allocation3], 1 }
 0x433   :  { %1389 = vsyncpa [#allocation5], 1 }

</bundles_post_ra>
